<compile_context>
chip_gen: v5e
topology: v5e:2x2
jax: 0.10.0
libtpu: 0.0.40
codegen_flags: <defaults>
</compile_context>

<pallas_src>
import jax
import jax.numpy as jnp
from jax.experimental import pallas as pl
from jax.experimental.pallas import tpu as pltpu


def _mean_pool_kernel(h_ref, m_ref, o_ref, acc_ref, cnt_ref):
    # h_ref: (TB, TS, H) activations; m_ref: (TB, TS) f32 mask; o_ref: (TB, H)
    # grid = (B // TB, S // TS); axis 1 is the sequence reduction ("arbitrary",
    # innermost) so acc_ref / cnt_ref and the resident output block carry
    # across it.
    s = pl.program_id(1)

    @pl.when(s == 0)
    def _init():
        acc_ref[...] = jnp.zeros_like(acc_ref)
        cnt_ref[...] = jnp.zeros_like(cnt_ref)

    h = h_ref[...].astype(jnp.float32)                   # (TB, TS, H)
    m = m_ref[...]                                       # (TB, TS), already f32
    acc_ref[...] += jnp.sum(h * m[:, :, None], axis=1)   # (TB, H) masked sum
    cnt_ref[...] += jnp.sum(m, axis=1, keepdims=True)    # (TB, 1) mask count

    @pl.when(s == pl.num_programs(1) - 1)
    def _finalize():
        # Exact reciprocal; clamp matches torch.clamp(min=1e-9).
        inv = 1.0 / jnp.maximum(cnt_ref[...], 1e-9)
        o_ref[...] = (acc_ref[...] * inv).astype(o_ref.dtype)


def _choose_tiles(B, S, H, h_itemsize, budget_bytes):
    """Pick (TB, TS) so the (TB, TS, H) hidden-state tile stays near
    `budget_bytes` and every block is sublane/lane legal:
      * TB is B itself or a multiple-of-8 divisor of B,
      * TS is S itself or a multiple-of-128 divisor of S (mask block stays
        lane-legal; each [b, s0:s0+TS, :] read is fully contiguous in HBM).
    """
    tb_cands = sorted({B} | {d for d in range(8, B, 8) if B % d == 0},
                      reverse=True)
    ts_cands = sorted({S} | {d for d in range(128, S, 128) if S % d == 0},
                      reverse=True)

    def tile_bytes(tb, ts):
        return tb * ts * H * h_itemsize

    best = None  # (bytes, tb, ts)
    for tb in tb_cands:
        for ts in ts_cands:
            b = tile_bytes(tb, ts)
            if b <= budget_bytes:
                if best is None or b > best[0]:
                    best = (b, tb, ts)
                break  # ts_cands is descending: first fit is largest for this tb

    if best is None:
        # Nothing fits the budget with a legal tiling: take the smallest legal
        # tile and let the derived vmem limit absorb the overshoot.
        # TODO(synk): pad B/S for pathological shapes (e.g. prime S with huge
        # H) where even the smallest legal tile would overflow physical VMEM.
        tb, ts = tb_cands[-1], ts_cands[-1]
    else:
        _, tb, ts = best

    # v7x has 2 TensorCores; keep >= 2 tiles on the parallel (batch) axis when
    # a smaller legal TB exists so both cores contribute HBM bandwidth.
    if B // tb < 2:
        smaller = [d for d in tb_cands if d < tb]
        if smaller:
            tb = smaller[0]
    return tb, ts


def _vmem_limit_bytes(tb, ts, H, h_itemsize):
    """Scoped-VMEM limit derived from the chosen tiles: double-buffered inputs
    + output + scratch, with headroom; clamped to v7x's 64 MiB physical VMEM."""
    h_tile = tb * ts * H * h_itemsize
    m_tile = tb * max(ts, 128) * 4
    o_tile = tb * max(H, 128) * 4
    scratch = tb * max(H, 128) * 4 + tb * 128 * 4  # acc + (lane-padded) count
    total = 2 * (h_tile + m_tile) + 2 * o_tile + scratch
    limit = int(total * 1.25) + (2 << 20)
    return max(16 << 20, min(limit, 64 << 20))


def mean_pooling(last_hidden_state, attention_mask, *, budget_bytes=4 << 20):
    """Masked mean over the sequence axis.

    last_hidden_state: [B, S, H] (any float dtype); attention_mask: [B, S]
    (bool / int / float). Returns [B, H] float32, matching MeanPooling.forward.
    """
    B, S, H = last_hidden_state.shape
    assert attention_mask.shape == (B, S)

    # Upcast the mask outside the kernel: bool/int8 masks would otherwise hit
    # sub-32-bit sublane-packing restrictions on the (TB, TS) block.  Mask
    # bytes are negligible next to the hidden state.
    mask_f32 = attention_mask.astype(jnp.float32)

    h_itemsize = jnp.dtype(last_hidden_state.dtype).itemsize
    TB, TS = _choose_tiles(B, S, H, h_itemsize, budget_bytes)
    # Batch (parallel) axis outermost, sequence reduction axis innermost so
    # the output tile stays accumulator-resident across the whole reduction.
    grid = (B // TB, S // TS)

    out = pl.pallas_call(
        _mean_pool_kernel,
        out_shape=jax.ShapeDtypeStruct((B, H), jnp.float32),
        grid_spec=pltpu.PrefetchScalarGridSpec(
            num_scalar_prefetch=0,
            grid=grid,
            in_specs=[
                pl.BlockSpec((TB, TS, H), lambda b, s: (b, s, 0)),
                pl.BlockSpec((TB, TS), lambda b, s: (b, s)),
            ],
            # Same output block across the S axis -> resident in VMEM, written
            # back once per batch tile (lane-dense (TB, H) slab).
            out_specs=pl.BlockSpec((TB, H), lambda b, s: (b, 0)),
            scratch_shapes=[
                pltpu.VMEM((TB, H), jnp.float32),  # running masked sum
                pltpu.VMEM((TB, 1), jnp.float32),  # running mask count
            ],
        ),
        compiler_params=pltpu.CompilerParams(
            dimension_semantics=("parallel", "arbitrary"),
            vmem_limit_bytes=_vmem_limit_bytes(TB, TS, H, h_itemsize),
        ),
    )(last_hidden_state, mask_f32)
    return out


def _reference(last_hidden_state, attention_mask):
    m = attention_mask[..., None].astype(jnp.float32)
    summed = jnp.sum(last_hidden_state.astype(jnp.float32) * m, axis=1)
    cnt = jnp.maximum(jnp.sum(m, axis=1), 1e-9)
    return summed / cnt


def _run_case(key, B, S, H, lens, dtype=jnp.float32, budget_bytes=4 << 20,
              atol=1e-5, rtol=1e-5):
    h = jax.random.normal(key, (B, S, H), dtype=jnp.float32).astype(dtype)
    mask = (jnp.arange(S)[None, :] < lens[:, None]).astype(jnp.int32)
    out = jax.block_until_ready(
        mean_pooling(h, mask, budget_bytes=budget_bytes))
    ref = _reference(h, mask)
    assert out.shape == (B, H)
    assert out.dtype == jnp.float32
    assert jnp.allclose(out, ref, atol=atol, rtol=rtol), "mismatch vs reference"


if __name__ == "__main__":
    key = jax.random.PRNGKey(0)
    k1, k2, k3, k4, k5 = jax.random.split(key, 5)

    # 1) Small case matching the module spec (B=2, S=8, H=32), with partially
    #    masked rows. Single grid step.
    _run_case(k1, B=2, S=8, H=32, lens=jnp.array([5, 3], dtype=jnp.int32))

    # 2) Multi-tile batch axis (TB capped so the parallel grid has >= 2 steps
    #    for v7x megacore), including a fully-masked row to exercise the clamp.
    lens2 = jax.random.randint(k2, (16,), minval=1, maxval=257).at[1].set(0)
    _run_case(k3, B=16, S=256, H=256, lens=lens2.astype(jnp.int32))

    # 3) Sequence-split path: a reduced budget forces TS=128 so the kernel
    #    accumulates across two S grid steps (pl.when init/finalize path).
    lens3 = jax.random.randint(k4, (8,), minval=0, maxval=257).astype(jnp.int32)
    _run_case(k5, B=8, S=256, H=256, lens=lens3, budget_bytes=1 << 20)

    # 4) bf16 activations (f32 accumulation inside the kernel).
    _run_case(k3, B=8, S=256, H=256, lens=lens3, dtype=jnp.bfloat16,
              atol=1e-4, rtol=1e-4)

    print("KERNEL_OK")
</pallas_src>

<mosaic_0001>
module attributes {stable_mosaic.version = 11 : i64} {
  func.func @_mean_pool_kernel(%arg0: i32, %arg1: i32, %arg2: memref<2x8x32xf32, #tpu.memory_space<vmem>>, %arg3: memref<2x8xf32, #tpu.memory_space<vmem>>, %arg4: memref<2x32xf32, #tpu.memory_space<vmem>>, %arg5: memref<2x32xf32, #tpu.memory_space<vmem>>, %arg6: memref<2x1xf32, #tpu.memory_space<vmem>>) attributes {dimension_semantics = [#tpu.dimension_semantics<parallel>, #tpu.dimension_semantics<arbitrary>], iteration_bounds = array<i64: 1, 1>, scalar_prefetch = 0 : i64, scratch_operands = 2 : i64, tpu.core_type = #tpu.core_type<tc>, window_params = [{transform_indices = @transform_0, window_bounds = array<i64: 2, 8, 32>}, {transform_indices = @transform_1, window_bounds = array<i64: 2, 8>}, {transform_indices = @transform_2, window_bounds = array<i64: 2, 32>}]} {
    %c0_i32 = arith.constant 0 : i32
    %0 = arith.cmpi eq, %arg1, %c0_i32 : i32
    %1 = arith.extui %0 : i1 to i32
    %c0_i32_0 = arith.constant 0 : i32
    %2 = arith.cmpi ne, %1, %c0_i32_0 : i32
    scf.if %2 {
      %cst_16 = arith.constant 0.000000e+00 : f32
      %20 = vector.broadcast %cst_16 : f32 to vector<2x32xf32>
      %c0_17 = arith.constant 0 : index
      %c0_18 = arith.constant 0 : index
      %21 = vector.load %arg5[%c0_17, %c0_18] : memref<2x32xf32, #tpu.memory_space<vmem>>, vector<2x32xf32>
      tpu.vector_store %arg5[%c0_17, %c0_18], %20 {strides = array<i32>} : memref<2x32xf32, #tpu.memory_space<vmem>>, vector<2x32xf32>,
      %cst_19 = arith.constant 0.000000e+00 : f32
      %22 = vector.broadcast %cst_19 : f32 to vector<2x1xf32>
      %c0_20 = arith.constant 0 : index
      %c0_21 = arith.constant 0 : index
      %23 = vector.load %arg6[%c0_20, %c0_21] : memref<2x1xf32, #tpu.memory_space<vmem>>, vector<2x1xf32>
      tpu.vector_store %arg6[%c0_20, %c0_21], %22 {strides = array<i32>} : memref<2x1xf32, #tpu.memory_space<vmem>>, vector<2x1xf32>,
    } else {
    }
    %c0 = arith.constant 0 : index
    %c0_1 = arith.constant 0 : index
    %c0_2 = arith.constant 0 : index
    %3 = vector.load %arg2[%c0, %c0_1, %c0_2] : memref<2x8x32xf32, #tpu.memory_space<vmem>>, vector<2x8x32xf32>
    %c0_3 = arith.constant 0 : index
    %c0_4 = arith.constant 0 : index
    %4 = vector.load %arg3[%c0_3, %c0_4] : memref<2x8xf32, #tpu.memory_space<vmem>>, vector<2x8xf32>
    %c0_5 = arith.constant 0 : index
    %c0_6 = arith.constant 0 : index
    %5 = vector.load %arg5[%c0_5, %c0_6] : memref<2x32xf32, #tpu.memory_space<vmem>>, vector<2x32xf32>
    %6 = vector.shape_cast %4 : vector<2x8xf32> to vector<2x8x1xf32>
    %7 = vector.broadcast %6 : vector<2x8x1xf32> to vector<2x8x32xf32>
    %8 = arith.mulf %3, %7 : vector<2x8x32xf32>
    %cst = arith.constant dense<0.000000e+00> : vector<2x32xf32>
    %9 = vector.multi_reduction <add>, %8, %cst [1] : vector<2x8x32xf32> to vector<2x32xf32>
    %10 = arith.addf %5, %9 : vector<2x32xf32>
    %c0_7 = arith.constant 0 : index
    %c0_8 = arith.constant 0 : index
    %11 = vector.load %arg5[%c0_7, %c0_8] : memref<2x32xf32, #tpu.memory_space<vmem>>, vector<2x32xf32>
    tpu.vector_store %arg5[%c0_7, %c0_8], %10 {strides = array<i32>} : memref<2x32xf32, #tpu.memory_space<vmem>>, vector<2x32xf32>,
    %c0_9 = arith.constant 0 : index
    %c0_10 = arith.constant 0 : index
    %12 = vector.load %arg6[%c0_9, %c0_10] : memref<2x1xf32, #tpu.memory_space<vmem>>, vector<2x1xf32>
    %cst_11 = arith.constant dense<0.000000e+00> : vector<2xf32>
    %13 = vector.multi_reduction <add>, %4, %cst_11 [1] : vector<2x8xf32> to vector<2xf32>
    %14 = vector.shape_cast %13 : vector<2xf32> to vector<2x1xf32>
    %15 = arith.addf %12, %14 : vector<2x1xf32>
    %c0_12 = arith.constant 0 : index
    %c0_13 = arith.constant 0 : index
    %16 = vector.load %arg6[%c0_12, %c0_13] : memref<2x1xf32, #tpu.memory_space<vmem>>, vector<2x1xf32>
    tpu.vector_store %arg6[%c0_12, %c0_13], %15 {strides = array<i32>} : memref<2x1xf32, #tpu.memory_space<vmem>>, vector<2x1xf32>,
    %c0_i32_14 = arith.constant 0 : i32
    %17 = arith.cmpi eq, %arg1, %c0_i32_14 : i32
    %18 = arith.extui %17 : i1 to i32
    %c0_i32_15 = arith.constant 0 : i32
    %19 = arith.cmpi ne, %18, %c0_i32_15 : i32
    scf.if %19 {
      %c0_16 = arith.constant 0 : index
      %c0_17 = arith.constant 0 : index
      %20 = vector.load %arg6[%c0_16, %c0_17] : memref<2x1xf32, #tpu.memory_space<vmem>>, vector<2x1xf32>
      %cst_18 = arith.constant 9.99999971E-10 : f32
      %21 = vector.broadcast %cst_18 : f32 to vector<2x1xf32>
      %22 = arith.maximumf %20, %21 : vector<2x1xf32>
      %cst_19 = arith.constant 1.000000e+00 : f32
      %23 = vector.broadcast %cst_19 : f32 to vector<2x1xf32>
      %24 = arith.divf %23, %22 : vector<2x1xf32>
      %c0_20 = arith.constant 0 : index
      %c0_21 = arith.constant 0 : index
      %25 = vector.load %arg5[%c0_20, %c0_21] : memref<2x32xf32, #tpu.memory_space<vmem>>, vector<2x32xf32>
      %26 = vector.broadcast %24 : vector<2x1xf32> to vector<2x32xf32>
      %27 = arith.mulf %25, %26 : vector<2x32xf32>
      %c0_22 = arith.constant 0 : index
      %c0_23 = arith.constant 0 : index
      %28 = vector.load %arg4[%c0_22, %c0_23] : memref<2x32xf32, #tpu.memory_space<vmem>>, vector<2x32xf32>
      tpu.vector_store %arg4[%c0_22, %c0_23], %27 {strides = array<i32>} : memref<2x32xf32, #tpu.memory_space<vmem>>, vector<2x32xf32>,
    } else {
    }
    return
  }
  func.func @transform_0(%arg0: i32, %arg1: i32) -> (i32, i32, i32) {
    %c0_i32 = arith.constant 0 : i32
    %c0_i32_0 = arith.constant 0 : i32
    return %arg0, %arg1, %c0_i32 : i32, i32, i32
  }
  func.func @transform_1(%arg0: i32, %arg1: i32) -> (i32, i32) {
    %c0_i32 = arith.constant 0 : i32
    return %arg0, %arg1 : i32, i32
  }
  func.func @transform_2(%arg0: i32, %arg1: i32) -> (i32, i32) {
    %c0_i32 = arith.constant 0 : i32
    %c0_i32_0 = arith.constant 0 : i32
    return %arg0, %c0_i32 : i32, i32
  }
}

</mosaic_0001>

<bundles_post_ra>
// kernel: tpu_custom_call.1
= control target key start
LH: loop header
LB: loop body
LE: loop exit
PB: predicated region body
PF: predicated region fallthrough
CT: control target
= control target key end

     0   :  { %7 = vsyncpa [#allocation5], 0  ;;  %s274_s0 = inlined_call_operand.hbm [shape: f32[2,8,32], index: 0, kind: input, shape index: {}]   ;;  %s275_s1 = inlined_call_operand.hbm [shape: f32[2,8], index: 1, kind: input, shape index: {}]   ;;  %s276_s2 = inlined_call_operand.hbm [shape: f32[2,32], index: 2, kind: output, shape index: {}]  }
   0x1   :  { %8 = vsyncpa [#allocation8], 0 }
   0x2   :  { %9 = vsyncpa [#allocation6], 0  ;;  %s14_s11 = sshll.u32 %s274_s0, 4  ;;  %s238_s12 = smov [#allocation4]   ;;  %s15_s11 = int_to_ptr.hbm [resolvable:$true] %s14_s11 }
   0x3   :  { %s16_s13 = sshll.u32 %s238_s12, 4  ;;  %s28_s16 = sshll.u32 %s275_s1, 4  ;;  %s17_s13 = int_to_ptr.vmem [resolvable:$true] %s16_s13  ;;  %s29_s16 = int_to_ptr.hbm [resolvable:$true] %s28_s16 }
   0x4   :  { %s239_s17 = smov 128   ;;  %s240_s18 = smov 8  }
   0x5   :  { %22 = dma.hbm_to_vmem [thread:$0]  %s15_s11, 256, %s17_s13, [#allocation5], %s239_s17, %s239_s17, %s240_s18  }
   0x6   :  { %s241_s19 = smov [#allocation7]  }
   0x7   :  { %s30_s20 = sshll.u32 %s241_s19, 4  ;;  %s31_s20 = int_to_ptr.vmem [resolvable:$true] %s30_s20 }
   0x8   :  { %33 = dma.hbm_to_vmem [thread:$0]  %s29_s16, 32, %s31_s20, [#allocation8]  }
   0x9   :  { %232 = dma.done.wait [#allocation5], 256  }
   0xa   :  { %233 = vsyncadd [#allocation5], 4294967040 }
   0xb   :  { %234 = dma.done.wait [#allocation8], 32  }
   0xc   :  { %235 = vsyncadd [#allocation8], 4294967264  ;;  %v55_v0 = vlaneseq  ;;  %vm48_vm0 = vcmask 1024   ;;  %v242_v1 = vmov 0.0   ;;  %vm94_vm1 = vcmask 58368   ;;  %v51_v24 = vld [vmem:[#allocation4 + $0x8] sm:$0xff] }
   0xd   :  { %49 = vst.msk [vmem:[#allocation3] sm:$0x3] %vm48_vm0, %v242_v1  ;;  %v52_v3 = vld [vmem:[#allocation7] sm:$0x3]  ;;  %v243_v7 = vmov 0   ;;  %vm46_vm2 = vcmask 254976  }
   0xe   :  { %v56_v2 = vshrl.u32 %v55_v0, 7  ;;  %v95_v4 = vsel %vm94_vm1, %v52_v3, 0.0  ;;  %v61_v5 = vperm.slane %v52_v3, 1  ;;  %v54_v6 = vperm.slane %v52_v3, 0  ;;  %47 = vst.msk [vmem:[#allocation2] sm:$0x3] %vm46_vm2, %v242_v1 }
   0xf   :  { %96 = vadd.xlane.f32.xlu0 %v95_v4  ;;  %v50_v26 = vld [vmem:[#allocation4] sm:$0xff]  ;;  %vm70_vm7 = vcmask 261120   ;;  %vm87_vm8 = vcmask 1041409   ;;  %s244_s0 = smov [#allocation9]   ;;  %s136_s23 = sshll.u32 %s276_s2, 4  ;;  %s137_s23 = int_to_ptr.hbm [resolvable:$true] %s136_s23 }
  0x10   :  { %155 = vset.pattern.permute.xlu1 %v56_v2  ;;  %154 = vset.pattern.permute.xlu0 %v56_v2  ;;  %s134_s1 = sshll.u32 %s244_s0, 4  ;;  %s135_s1 = int_to_ptr.vmem [resolvable:$true] %s134_s1 }
  0x14   :  { %v93_v8 = vld [vmem:[#allocation3] sm:$0x3] }
  0x15   :  { %v53_v44 = vld [vmem:[#allocation2] sm:$0x3] }
  0x18   :  { %66 = vperm.xlu1 %155, %v61_v5  }
  0x20   :  { %156 = vset.pattern.permute.xlu1 %v243_v7 }
  0x23   :  { %59 = vperm.xlu0 %154, %v54_v6  }
  0x2b   :  { %157 = vset.pattern.permute.xlu0 %v243_v7 }
  0x82   :  { %v97_v9 = vpop.xlane.xlu0 %96 }
  0x83   :  { %v98_v10 = vadd.f32 %v97_v9, %v93_v8 }
  0x85   :  { %100 = vst.msk [vmem:[#allocation3] sm:$0x3] %vm48_vm0, %v98_v10 }
  0x8a   :  { %v67_v23 = vpop.permute.xlu1 %66 }
  0x8b   :  { %v69_v27 = vmul.f32 %v67_v23, %v51_v24 }
  0x8c   :  { %v104_v11 = vld [vmem:[#allocation3] sm:$0x3] }
  0x8d   :  { %v105_v12 = vmax.f32 %v104_v11, 1e-09  ;;  %v78_v29 = vsel %vm70_vm7, %v69_v27, 0.0 }
  0x8e   :  { %v79_v31 = vrot.slane %v78_v29, 4 }
  0x8f   :  { %158 = vrcp.f32 %v105_v12  ;;  %v117_v16 = vand.u32 2147483648, %v105_v12  ;;  %v115_v18 = vand.u32 2147483647, %v105_v12  ;;  %vm111_vm4 = vweird.f32 %v105_v12 }
  0x90   :  { %v80_v33 = vadd.f32 %v79_v31, %v78_v29 }
  0x91   :  { %v118_v20 = vor.u32 1.1754944e-38, %v117_v16  ;;  %vm116_vm6 = vcmp.eq.f32.partialorder %v115_v18, 8.507059e+37 }
  0x92   :  { %v81_v35 = vrot.slane %v80_v33, 2 }
  0x94   :  { %v82_v37 = vadd.f32 %v81_v35, %v80_v33 }
  0x95   :  { %v159_v13 = vpop.eup %158  ;;  %v60_v25 = vpop.permute.xlu0 %59 }
  0x96   :  { %v107_v14 = vmul.f32 %v159_v13, %v105_v12  ;;  %vm112_vm3 = vweird.f32 %v159_v13  ;;  %v68_v28 = vmul.f32 %v60_v25, %v50_v26  ;;  %v83_v39 = vrot.slane %v82_v37, 1 }
  0x97   :  { %vm113_vm5 = vmor %vm111_vm4, %vm112_vm3 }
  0x98   :  { %v108_v15 = vsub.f32 1.0, %v107_v14  ;;  %v71_v30 = vsel %vm70_vm7, %v68_v28, 0.0  ;;  %v84_v41 = vadd.f32 %v83_v39, %v82_v37 }
  0x99   :  { %v72_v32 = vrot.slane %v71_v30, 4 }
  0x9a   :  { %v109_v17 = vmul.f32 %v159_v13, %v108_v15 }
  0x9b   :  { %v73_v34 = vadd.f32 %v72_v32, %v71_v30 }
  0x9c   :  { %v110_v19 = vadd.f32 %v159_v13, %v109_v17 }
  0x9d   :  { %v74_v36 = vrot.slane %v73_v34, 2 }
  0x9e   :  { %v114_v21 = vsel %vm113_vm5, %v159_v13, %v110_v19 }
  0x9f   :  { %v119_v22 = vsel %vm116_vm6, %v118_v20, %v114_v21  ;;  %v75_v38 = vadd.f32 %v74_v36, %v73_v34 }
  0xa0   :  { %124 = vperm.xlu1 %156, %v119_v22  }
  0xa1   :  { %v76_v40 = vrot.slane %v75_v38, 1 }
  0xa3   :  { %v77_v42 = vadd.f32 %v76_v40, %v75_v38 }
  0xa5   :  { %v88_v43 = vsel %vm87_vm8, %v84_v41, %v77_v42 }
  0xa6   :  { %v90_v45 = vadd.f32 %v88_v43, %v53_v44 }
  0xa8   :  { %92 = vst.msk [vmem:[#allocation2] sm:$0x3] %vm46_vm2, %v90_v45 }
  0xaf   :  { %v121_v47 = vld [vmem:[#allocation2] sm:$0x3] }
 0x112   :  { %v125_v46 = vpop.permute.xlu1 %124 }
 0x113   :  { %v127_v48 = vmul.f32 %v125_v46, %v121_v47 }
 0x115   :  { %128 = vst.msk [vmem:[#allocation9] sm:$0x3] %vm46_vm2, %v127_v48 }
 0x116   :  { %139 = dma.vmem_to_hbm [thread:$0]  %s135_s1, 32, %s137_s23, [#allocation6]  }
 0x117   :  { %236 = dma.done.wait [#allocation6], 32  }
 0x118   :  { %237 = vsyncadd [#allocation6], 4294967264 }
 0x119   :  { %144 = vsyncpa [#allocation5], 1 }
 0x11a   :  { %145 = vsyncpa [#allocation8], 1 }
 0x11b   :  { %146 = vsyncpa [#allocation6], 1 }

</bundles_post_ra>
